<compile_context>
chip_gen: v5e
topology: v5e:2x2
jax: 0.10.0
libtpu: 0.0.40
codegen_flags: <defaults>
</compile_context>

<pallas_src>
import functools
from typing import NamedTuple

import jax
import jax.numpy as jnp
from jax.experimental import pallas as pl
from jax.experimental.pallas import tpu as pltpu


def _cdiv(a, b):
    return -(-a // b)


def _round_up(v, m):
    return _cdiv(v, m) * m


def _fit_tile(dim, t_max, align):
    """Largest tile <= t_max (multiple of `align`) minimizing padding of `dim`."""
    dim_a = _round_up(dim, align)
    if dim_a <= t_max:
        return dim_a
    nblk = _cdiv(dim_a, t_max)
    return _round_up(_cdiv(dim, nblk), align)


def _chip_config():
    """Per-generation tile ceilings, VMEM cap (bytes) and TensorCore count."""
    kind = ""
    try:
        kind = (jax.devices()[0].device_kind or "").lower()
    except Exception:  # pragma: no cover - defensive; fall through to default
        pass
    if "v7" in kind:
        # v7x: 2 TCs/chip, only 64 MiB physical VMEM/TC, ~3.2 TB/s HBM
        # (knee ~640); keep double-buffered blocks well under ~48 MiB.
        return dict(tm=512, tn=640, tk=1024, vmem_cap=48 << 20, cores=2)
    if "v6" in kind:
        # v6e: 918 TF/s vs ~1.4 TB/s HBM -> needs ~1024 tiles; 128 MiB VMEM.
        return dict(tm=1024, tn=1024, tk=1024, vmem_cap=96 << 20, cores=1)
    # v5e (and safe fallback for older chips): knee ~512x512; modest VMEM use.
    return dict(tm=512, tn=512, tk=1024, vmem_cap=64 << 20, cores=1)


# ----------------------------- kernels -------------------------------------


def _linear_kernel_acc(x_ref, w_ref, b_ref, o_ref, acc_ref):
    """Multi-K-step path: f32 VMEM accumulator resident across the K axis."""
    k = pl.program_id(2)

    @pl.when(k == 0)
    def _():
        acc_ref[...] = jnp.zeros_like(acc_ref)

    # bf16 x bf16 -> f32 on the MXU.
    acc_ref[...] += jnp.dot(x_ref[...], w_ref[...],
                            preferred_element_type=jnp.float32)

    @pl.when(k == pl.num_programs(2) - 1)
    def _():
        # Bias added once, in f32, in the epilogue only.
        o_ref[...] = (acc_ref[...] + b_ref[...]).astype(o_ref.dtype)


def _linear_kernel_single(x_ref, w_ref, b_ref, o_ref):
    """Single-K-block fast path: no scratch accumulator, no predication."""
    o_ref[...] = (jnp.dot(x_ref[...], w_ref[...],
                          preferred_element_type=jnp.float32)
                  + b_ref[...]).astype(o_ref.dtype)


# ----------------------------- host wrappers --------------------------------


class PackedLinear(NamedTuple):
    """Linear params packed once (bf16, tile-padded) for repeated calls."""
    w: jax.Array     # [Kp, Np] bf16, zero-padded
    b: jax.Array     # [1, Np]  f32,  zero-padded
    h_in: int
    h_out: int
    tn: int
    tk: int
    tm_max: int
    vmem_cap: int


def prepare_linear_params(w, b, *, tn_max=None, tk_max=None):
    """One-time pack: cast W->bf16 / b->f32 and zero-pad to tile multiples.

    Done OUTSIDE the hot path so each forward call streams the pre-stored
    bf16 weights directly (no per-call f32 read + bf16 rewrite of W).
    """
    H_in, H_out = w.shape
    cfg = _chip_config()
    tn_cap = int(tn_max) if tn_max is not None else cfg["tn"]
    tk_cap = int(tk_max) if tk_max is not None else cfg["tk"]

    tn = _fit_tile(H_out, tn_cap, 128)
    tk = _fit_tile(H_in, tk_cap, 128)

    # v7x megacore: when the whole (padded) output width fits one tile, split
    # it into >= 2 lane-dense N blocks so both TensorCores get work.
    if cfg["cores"] > 1:
        h_out_a = _round_up(H_out, 128)
        if _round_up(H_out, tn) == tn and h_out_a >= 256:
            tn = _round_up(_cdiv(h_out_a, 2), 128)

    Np = _round_up(H_out, tn)
    Kp = _round_up(H_in, tk)

    wb = w.astype(jnp.bfloat16)
    bf = b.astype(jnp.float32).reshape(1, H_out)
    if (Kp, Np) != (H_in, H_out):
        wb = jnp.pad(wb, ((0, Kp - H_in), (0, Np - H_out)))
    if Np != H_out:
        bf = jnp.pad(bf, ((0, 0), (0, Np - H_out)))

    return PackedLinear(w=wb, b=bf, h_in=H_in, h_out=H_out, tn=tn, tk=tk,
                        tm_max=cfg["tm"], vmem_cap=cfg["vmem_cap"])


@functools.partial(jax.jit,
                   static_argnames=("h_out", "tn", "tk", "tm_max", "vmem_cap"))
def _linear_pallas(x, w_p, b_p, *, h_out, tn, tk, tm_max, vmem_cap):
    """x: [B, H_in] (any float dtype); w_p/b_p pre-packed.  Returns [B, h_out]."""
    B, H_in = x.shape
    Kp, Np = w_p.shape
    out_dtype = x.dtype

    # M tile: clamp to the problem (multiples of 16 for bf16 sublane packing),
    # minimizing padding waste for B slightly above a tile multiple.
    tm = _fit_tile(B, tm_max, 16)
    Bp = _round_up(B, tm)

    xb = x.astype(jnp.bfloat16)
    if (Bp, Kp) != (B, H_in):
        # Zero-pad (K pad must be zeros so it contributes nothing).
        xb = jnp.pad(xb, ((0, Bp - B), (0, Kp - H_in)))

    gm = Bp // tm
    gn = Np // tn
    gk = Kp // tk

    # VMEM budget derived from the actual block footprint (+50% headroom),
    # floored at the default scoped limit and capped per chip generation.
    out_bytes = jnp.dtype(out_dtype).itemsize
    block_bytes = (2 * tm * tk * 2            # x double buffer (bf16)
                   + 2 * tk * tn * 2          # W double buffer (bf16)
                   + 2 * tm * tn * out_bytes  # output double buffer
                   + 2 * tn * 4)              # bias
    if gk > 1:
        block_bytes += tm * tn * 4            # f32 accumulator scratch
    vmem_limit = min(vmem_cap, max(32 << 20, int(block_bytes * 1.5)))

    out_shape = jax.ShapeDtypeStruct((Bp, Np), out_dtype)

    if gk == 1:
        # Fast path: whole K reduction in one tile -> no scratch accumulator.
        out_p = pl.pallas_call(
            _linear_kernel_single,
            out_shape=out_shape,
            grid_spec=pltpu.PrefetchScalarGridSpec(
                num_scalar_prefetch=0,
                grid=(gm, gn),
                in_specs=[
                    pl.BlockSpec((tm, tk), lambda i, j: (i, 0)),   # x tile
                    pl.BlockSpec((tk, tn), lambda i, j: (0, j)),   # W tile
                    pl.BlockSpec((1, tn), lambda i, j: (0, j)),    # bias
                ],
                out_specs=pl.BlockSpec((tm, tn), lambda i, j: (i, j)),
            ),
            compiler_params=pltpu.CompilerParams(
                dimension_semantics=("parallel", "parallel"),
                vmem_limit_bytes=vmem_limit,
            ),
        )(xb, w_p, b_p)
    else:
        out_p = pl.pallas_call(
            _linear_kernel_acc,
            out_shape=out_shape,
            grid_spec=pltpu.PrefetchScalarGridSpec(
                num_scalar_prefetch=0,
                grid=(gm, gn, gk),                       # K (reduction) last
                in_specs=[
                    pl.BlockSpec((tm, tk), lambda i, j, k: (i, k)),  # x tile
                    pl.BlockSpec((tk, tn), lambda i, j, k: (k, j)),  # W tile
                    pl.BlockSpec((1, tn), lambda i, j, k: (0, j)),   # bias
                ],
                out_specs=pl.BlockSpec((tm, tn), lambda i, j, k: (i, j)),
                scratch_shapes=[pltpu.VMEM((tm, tn), jnp.float32)],  # f32 acc
            ),
            compiler_params=pltpu.CompilerParams(
                dimension_semantics=("parallel", "parallel", "arbitrary"),
                vmem_limit_bytes=vmem_limit,
            ),
        )(xb, w_p, b_p)

    if (Bp, Np) != (B, h_out):
        out_p = out_p[:B, :h_out]
    return out_p


def linear_pallas(x, packed: PackedLinear):
    return _linear_pallas(x, packed.w, packed.b,
                          h_out=packed.h_out, tn=packed.tn, tk=packed.tk,
                          tm_max=packed.tm_max, vmem_cap=packed.vmem_cap)


def pass_hidden_forward(inputs, packed: PackedLinear):
    """PassHidden.forward: (x, y) -> (layers(x), y)."""
    x, y = inputs
    # `y` is a pure pass-through (identity) — no kernel needed.
    return (linear_pallas(x, packed), y)


if __name__ == "__main__":
    # Small shapes consistent with the module (Linear as `layers`).
    B, H_IN, H_OUT = 8, 512, 256
    Y_SHAPE = (8, 16)                  # arbitrary pass-through payload

    key = jax.random.PRNGKey(0)
    kx, ky, kw, kb = jax.random.split(key, 4)

    x = jax.random.normal(kx, (B, H_IN), dtype=jnp.float32)
    y = jax.random.normal(ky, Y_SHAPE, dtype=jnp.float32)
    # Deterministic "Linear" parameter init (synthetic, not a checkpoint).
    w = jax.random.normal(kw, (H_IN, H_OUT), dtype=jnp.float32) * 0.02
    b = jax.random.normal(kb, (H_OUT,), dtype=jnp.float32) * 0.02

    ref_f32 = x @ w + b
    ref_bf16 = (jnp.dot(x.astype(jnp.bfloat16), w.astype(jnp.bfloat16),
                        preferred_element_type=jnp.float32) + b)

    # --- Path 1: default tiles -> single-K-block fast path (no scratch). ----
    packed = prepare_linear_params(w, b)
    out_x, out_y = pass_hidden_forward((x, y), packed)
    out_x = jax.block_until_ready(out_x)
    out_y = jax.block_until_ready(out_y)

    assert out_x.shape == (B, H_OUT)
    assert out_y.shape == Y_SHAPE
    # bf16 operands -> loosened tolerance vs the f32 reference.
    assert jnp.allclose(out_x, ref_f32, atol=5e-2, rtol=5e-2), (
        float(jnp.max(jnp.abs(out_x - ref_f32))))
    # Tight check vs a bf16-operand / f32-accumulate reference (single dot).
    assert jnp.allclose(out_x, ref_bf16, atol=1e-3, rtol=1e-3)
    assert jnp.array_equal(out_y, y)

    # --- Path 2: force tk=256 -> 2 K grid steps (accumulator init/epilogue). -
    packed_acc = prepare_linear_params(w, b, tk_max=256)
    out_x2, out_y2 = pass_hidden_forward((x, y), packed_acc)
    out_x2 = jax.block_until_ready(out_x2)
    out_y2 = jax.block_until_ready(out_y2)

    assert out_x2.shape == (B, H_OUT)
    assert jnp.allclose(out_x2, ref_f32, atol=5e-2, rtol=5e-2)
    # Looser vs ref_bf16: split-K partial-sum order differs from a fused dot.
    assert jnp.allclose(out_x2, ref_bf16, atol=1e-2, rtol=1e-2)
    assert jnp.array_equal(out_y2, y)

    print("KERNEL_OK")
</pallas_src>

<mosaic_0001>
module attributes {stable_mosaic.version = 11 : i64} {
  func.func @_linear_kernel_single(%arg0: i32, %arg1: i32, %arg2: memref<16x512xbf16, #tpu.memory_space<vmem>>, %arg3: memref<512x256xbf16, #tpu.memory_space<vmem>>, %arg4: memref<1x256xf32, #tpu.memory_space<vmem>>, %arg5: memref<16x256xf32, #tpu.memory_space<vmem>>) attributes {dimension_semantics = [#tpu.dimension_semantics<parallel>, #tpu.dimension_semantics<parallel>], iteration_bounds = array<i64: 1, 1>, scalar_prefetch = 0 : i64, scratch_operands = 0 : i64, tpu.core_type = #tpu.core_type<tc>, window_params = [{transform_indices = @transform_0, window_bounds = array<i64: 16, 512>}, {transform_indices = @transform_1, window_bounds = array<i64: 512, 256>}, {transform_indices = @transform_2, window_bounds = array<i64: 1, 256>}, {transform_indices = @transform_3, window_bounds = array<i64: 16, 256>}]} {
    %c0 = arith.constant 0 : index
    %c0_0 = arith.constant 0 : index
    %0 = vector.load %arg2[%c0, %c0_0] : memref<16x512xbf16, #tpu.memory_space<vmem>>, vector<16x512xbf16>
    %c0_1 = arith.constant 0 : index
    %c0_2 = arith.constant 0 : index
    %1 = vector.load %arg3[%c0_1, %c0_2] : memref<512x256xbf16, #tpu.memory_space<vmem>>, vector<512x256xbf16>
    %cst = arith.constant dense<0.000000e+00> : vector<16x256xf32>
    %2 = tpu.matmul %0, %1, %cst {dimension_numbers = #tpu.dot_dimension_numbers<[1], [0], [0], [1], [0, 0, 1, 1], [], []>} : vector<16x512xbf16>, vector<512x256xbf16>, vector<16x256xf32> -> vector<16x256xf32>
    %c0_3 = arith.constant 0 : index
    %c0_4 = arith.constant 0 : index
    %3 = vector.load %arg4[%c0_3, %c0_4] : memref<1x256xf32, #tpu.memory_space<vmem>>, vector<1x256xf32>
    %4 = vector.broadcast %3 : vector<1x256xf32> to vector<16x256xf32>
    %5 = arith.addf %2, %4 : vector<16x256xf32>
    %c0_5 = arith.constant 0 : index
    %c0_6 = arith.constant 0 : index
    %6 = vector.load %arg5[%c0_5, %c0_6] : memref<16x256xf32, #tpu.memory_space<vmem>>, vector<16x256xf32>
    tpu.vector_store %arg5[%c0_5, %c0_6], %5 {strides = array<i32>} : memref<16x256xf32, #tpu.memory_space<vmem>>, vector<16x256xf32>,
    return
  }
  func.func @transform_0(%arg0: i32, %arg1: i32) -> (i32, i32) {
    %c0_i32 = arith.constant 0 : i32
    %c0_i32_0 = arith.constant 0 : i32
    return %arg0, %c0_i32 : i32, i32
  }
  func.func @transform_1(%arg0: i32, %arg1: i32) -> (i32, i32) {
    %c0_i32 = arith.constant 0 : i32
    %c0_i32_0 = arith.constant 0 : i32
    return %c0_i32, %arg1 : i32, i32
  }
  func.func @transform_2(%arg0: i32, %arg1: i32) -> (i32, i32) {
    %c0_i32 = arith.constant 0 : i32
    %c0_i32_0 = arith.constant 0 : i32
    return %c0_i32, %arg1 : i32, i32
  }
  func.func @transform_3(%arg0: i32, %arg1: i32) -> (i32, i32) {
    %c0_i32 = arith.constant 0 : i32
    return %arg0, %arg1 : i32, i32
  }
}

</mosaic_0001>

<bundles_post_ra>
// kernel: _linear_pallas.1
= control target key start
LH: loop header
LB: loop body
LE: loop exit
PB: predicated region body
PF: predicated region fallthrough
CT: control target
= control target key end

     0   :  { %8 = vsyncpa [#allocation3], 0  ;;  %s934_s15 = smov [#allocation2]   ;;  %s935_s17 = smov 128   ;;  %s1015_s0 = inlined_call_operand.vmem [shape: bf16[16,512], index: 0, kind: input, shape index: {}]   ;;  %s1016_s1 = inlined_call_operand.hbm [shape: bf16[512,256], index: 1, kind: input, shape index: {}]   ;;  %s1017_s2 = inlined_call_operand.vmem [shape: f32[1,256], index: 2, kind: input, shape index: {}]   ;;  %s1018_s3 = inlined_call_operand.vmem [shape: f32[16,256], index: 3, kind: output, shape index: {}]  }
   0x1   :  { %s15_s14 = sshll.u32 %s1016_s1, 4  ;;  %s17_s16 = sshll.u32 %s934_s15, 4  ;;  %s16_s14 = int_to_ptr.hbm [resolvable:$true] %s15_s14  ;;  %s18_s16 = int_to_ptr.vmem [resolvable:$true] %s17_s16 }
   0x2   :  { %s936_s18 = smov 8  }
   0x3   :  { %23 = dma.hbm_to_vmem [thread:$0]  %s16_s14, 8192, %s18_s16, [#allocation3], %s935_s17, %s935_s17, %s936_s18  }
   0x4   :  { %932 = dma.done.wait [#allocation3], 8192  }
   0x5   :  { %933 = vsyncadd [#allocation3], 4294959104  ;;  %v639_v0 = vld [vmem:[#allocation2 + $0x70] sm:$0xf]  ;;  %v856_v1 = vld [vmem:[#allocation2 + $0x74] sm:$0xf0] }
   0x6   :  { %v703_v2 = vld [vmem:[#allocation2 + $0xf0] sm:$0xf]  ;;  %v640_v3 = vor.u32 %v856_v1, %v639_v0  ;;  %v872_v4 = vld [vmem:[#allocation2 + $0xf4] sm:$0xf0]  ;;  %v631_v11 = vld [vmem:[#allocation2 + $0x60] sm:$0xf] }
   0x7   :  { %v767_v5 = vld [vmem:[#allocation2 + $0x170] sm:$0xf]  ;;  %v888_v6 = vld [vmem:[#allocation2 + $0x174] sm:$0xf0]  ;;  %v704_v7 = vor.u32 %v872_v4, %v703_v2  ;;  %v854_v13 = vld [vmem:[#allocation2 + $0x64] sm:$0xf0] }
   0x8   :  { %v768_v8 = vor.u32 %v888_v6, %v767_v5  ;;  %v831_v9 = vld [vmem:[#allocation2 + $0x1f0] sm:$0xf]  ;;  %v904_v10 = vld [vmem:[#allocation2 + $0x1f4] sm:$0xf0]  ;;  %444 = vmatpush.bf16.msra.mxu0 %v640_v3  ;;  %v695_v14 = vld [vmem:[#allocation2 + $0xe0] sm:$0xf]  ;;  %v632_v16 = vor.u32 %v854_v13, %v631_v11 }
   0x9   :  { %v832_v12 = vor.u32 %v904_v10, %v831_v9  ;;  %v870_v15 = vld [vmem:[#allocation2 + $0xe4] sm:$0xf0]  ;;  %458 = vmatpush.bf16.msra.mxu1 %v704_v7  ;;  %v759_v18 = vld [vmem:[#allocation2 + $0x160] sm:$0xf]  ;;  %v623_v23 = vld [vmem:[#allocation2 + $0x50] sm:$0xf] }
   0xa   :  { %472 = vmatpush.bf16.msra.mxu2 %v768_v8  ;;  %v696_v17 = vor.u32 %v870_v15, %v695_v14  ;;  %v886_v19 = vld [vmem:[#allocation2 + $0x164] sm:$0xf0]  ;;  %v823_v20 = vld [vmem:[#allocation2 + $0x1e0] sm:$0xf]  ;;  %v852_v24 = vld [vmem:[#allocation2 + $0x54] sm:$0xf0] }
   0xb   :  { %486 = vmatpush.bf16.msra.mxu3 %v832_v12  ;;  %v760_v21 = vor.u32 %v886_v19, %v759_v18  ;;  %v902_v22 = vld [vmem:[#allocation2 + $0x1e4] sm:$0xf0]  ;;  %v687_v26 = vld [vmem:[#allocation2 + $0xd0] sm:$0xf]  ;;  %v868_v27 = vld [vmem:[#allocation2 + $0xd4] sm:$0xf0]  ;;  %v624_v29 = vor.u32 %v852_v24, %v623_v23 }
   0xc   :  { %v824_v25 = vor.u32 %v902_v22, %v823_v20  ;;  %v751_v28 = vld [vmem:[#allocation2 + $0x150] sm:$0xf]  ;;  %445 = vmatpush.bf16.msra.mxu0 %v632_v16  ;;  %v884_v30 = vld [vmem:[#allocation2 + $0x154] sm:$0xf0]  ;;  %v688_v33 = vor.u32 %v868_v27, %v687_v26  ;;  %v615_v35 = vld [vmem:[#allocation2 + $0x40] sm:$0xf] }
   0xd   :  { %v815_v31 = vld [vmem:[#allocation2 + $0x1d0] sm:$0xf]  ;;  %v900_v32 = vld [vmem:[#allocation2 + $0x1d4] sm:$0xf0]  ;;  %459 = vmatpush.bf16.msra.mxu1 %v696_v17  ;;  %v752_v34 = vor.u32 %v884_v30, %v751_v28  ;;  %v850_v36 = vld [vmem:[#allocation2 + $0x44] sm:$0xf0] }
   0xe   :  { %473 = vmatpush.bf16.msra.mxu2 %v760_v21  ;;  %v679_v37 = vld [vmem:[#allocation2 + $0xc0] sm:$0xf]  ;;  %v816_v38 = vor.u32 %v900_v32, %v815_v31  ;;  %v866_v39 = vld [vmem:[#allocation2 + $0xc4] sm:$0xf0]  ;;  %v616_v44 = vor.u32 %v850_v36, %v615_v35  ;;  %v607_v47 = vld [vmem:[#allocation2 + $0x30] sm:$0xf] }
   0xf   :  { %487 = vmatpush.bf16.msra.mxu3 %v824_v25  ;;  %v743_v40 = vld [vmem:[#allocation2 + $0x140] sm:$0xf]  ;;  %v882_v41 = vld [vmem:[#allocation2 + $0x144] sm:$0xf0]  ;;  %v680_v45 = vor.u32 %v866_v39, %v679_v37  ;;  %v848_v48 = vld [vmem:[#allocation2 + $0x34] sm:$0xf0] }
  0x10   :  { %v807_v42 = vld [vmem:[#allocation2 + $0x1c0] sm:$0xf]  ;;  %v898_v43 = vld [vmem:[#allocation2 + $0x1c4] sm:$0xf0]  ;;  %446 = vmatpush.bf16.msra.mxu0 %v624_v29  ;;  %v744_v46 = vor.u32 %v882_v41, %v743_v40  ;;  %v671_v49 = vld [vmem:[#allocation2 + $0xb0] sm:$0xf]  ;;  %v608_v56 = vor.u32 %v848_v48, %v607_v47 }
  0x11   :  { %460 = vmatpush.bf16.msra.mxu1 %v688_v33  ;;  %v808_v50 = vor.u32 %v898_v43, %v807_v42  ;;  %v864_v51 = vld [vmem:[#allocation2 + $0xb4] sm:$0xf0]  ;;  %v735_v52 = vld [vmem:[#allocation2 + $0x130] sm:$0xf]  ;;  %v599_v59 = vld [vmem:[#allocation2 + $0x20] sm:$0xf] }
  0x12   :  { %474 = vmatpush.bf16.msra.mxu2 %v752_v34  ;;  %v880_v53 = vld [vmem:[#allocation2 + $0x134] sm:$0xf0]  ;;  %v799_v54 = vld [vmem:[#allocation2 + $0x1b0] sm:$0xf]  ;;  %v672_v57 = vor.u32 %v864_v51, %v671_v49  ;;  %v846_v60 = vld [vmem:[#allocation2 + $0x24] sm:$0xf0] }
  0x13   :  { %488 = vmatpush.bf16.msra.mxu3 %v816_v38  ;;  %v896_v55 = vld [vmem:[#allocation2 + $0x1b4] sm:$0xf0]  ;;  %v736_v58 = vor.u32 %v880_v53, %v735_v52  ;;  %v663_v61 = vld [vmem:[#allocation2 + $0xa0] sm:$0xf]  ;;  %v862_v63 = vld [vmem:[#allocation2 + $0xa4] sm:$0xf0]  ;;  %v600_v4 = vor.u32 %v846_v60, %v599_v59 }
  0x14   :  { %447 = vmatpush.bf16.msra.mxu0 %v616_v44  ;;  %v800_v62 = vor.u32 %v896_v55, %v799_v54  ;;  %v727_v0 = vld [vmem:[#allocation2 + $0x120] sm:$0xf]  ;;  %v878_v1 = vld [vmem:[#allocation2 + $0x124] sm:$0xf0]  ;;  %v664_v5 = vor.u32 %v862_v63, %v663_v61  ;;  %v591_v7 = vld [vmem:[#allocation2 + $0x10] sm:$0xf] }
  0x15   :  { %461 = vmatpush.bf16.msra.mxu1 %v680_v45  ;;  %v791_v2 = vld [vmem:[#allocation2 + $0x1a0] sm:$0xf]  ;;  %v894_v3 = vld [vmem:[#allocation2 + $0x1a4] sm:$0xf0]  ;;  %v728_v6 = vor.u32 %v878_v1, %v727_v0  ;;  %v844_v8 = vld [vmem:[#allocation2 + $0x14] sm:$0xf0] }
  0x16   :  { %475 = vmatpush.bf16.msra.mxu2 %v744_v46  ;;  %v655_v9 = vld [vmem:[#allocation2 + $0x90] sm:$0xf]  ;;  %v792_v10 = vor.u32 %v894_v3, %v791_v2  ;;  %v860_v11 = vld [vmem:[#allocation2 + $0x94] sm:$0xf0]  ;;  %v583_v16 = vld [vmem:[#allocation2] sm:$0xf]  ;;  %v592_v17 = vor.u32 %v844_v8, %v591_v7 }
  0x17   :  { %489 = vmatpush.bf16.msra.mxu3 %v808_v50  ;;  %v719_v12 = vld [vmem:[#allocation2 + $0x110] sm:$0xf]  ;;  %v876_v13 = vld [vmem:[#allocation2 + $0x114] sm:$0xf0]  ;;  %v842_v18 = vld [vmem:[#allocation2 + $0x4] sm:$0xf0]  ;;  %v656_v21 = vor.u32 %v860_v11, %v655_v9 }
  0x18   :  { %448 = vmatpush.bf16.msra.mxu0 %v608_v56  ;;  %v783_v14 = vld [vmem:[#allocation2 + $0x190] sm:$0xf]  ;;  %v892_v15 = vld [vmem:[#allocation2 + $0x194] sm:$0xf0]  ;;  %v647_v19 = vld [vmem:[#allocation2 + $0x80] sm:$0xf]  ;;  %v720_v22 = vor.u32 %v876_v13, %v719_v12  ;;  %v584_v33 = vor.u32 %v842_v18, %v583_v16 }
  0x19   :  { %462 = vmatpush.bf16.msra.mxu1 %v672_v57  ;;  %v858_v20 = vld [vmem:[#allocation2 + $0x84] sm:$0xf0]  ;;  %v711_v23 = vld [vmem:[#allocation2 + $0x100] sm:$0xf]  ;;  %v784_v26 = vor.u32 %v892_v15, %v783_v14  ;;  %v855_v28 = vld [vmem:[#allocation2 + $0x74] sm:$0xf] }
  0x1a   :  { %476 = vmatpush.bf16.msra.mxu2 %v736_v58  ;;  %v874_v24 = vld [vmem:[#allocation2 + $0x104] sm:$0xf0]  ;;  %v775_v25 = vld [vmem:[#allocation2 + $0x180] sm:$0xf]  ;;  %v641_v29 = vld [vmem:[#allocation2 + $0x78] sm:$0xf0]  ;;  %v648_v37 = vor.u32 %v858_v20, %v647_v19 }
  0x1b   :  { %490 = vmatpush.bf16.msra.mxu3 %v800_v62  ;;  %v890_v27 = vld [vmem:[#allocation2 + $0x184] sm:$0xf0]  ;;  %v871_v30 = vld [vmem:[#allocation2 + $0xf4] sm:$0xf]  ;;  %v705_v31 = vld [vmem:[#allocation2 + $0xf8] sm:$0xf0]  ;;  %v712_v38 = vor.u32 %v874_v24, %v711_v23  ;;  %v644_v44 = vor.u32 %v855_v28, %v641_v29 }
  0x1c   :  { %449 = vmatpush.bf16.msra.mxu0 %v600_v4  ;;  %v887_v32 = vld [vmem:[#allocation2 + $0x174] sm:$0xf]  ;;  %v769_v34 = vld [vmem:[#allocation2 + $0x178] sm:$0xf0]  ;;  %v853_v39 = vld [vmem:[#allocation2 + $0x64] sm:$0xf]  ;;  %v776_v43 = vor.u32 %v890_v27, %v775_v25  ;;  %v708_v49 = vor.u32 %v871_v30, %v705_v31 }
  0x1d   :  { %463 = vmatpush.bf16.msra.mxu1 %v664_v5  ;;  %v903_v35 = vld [vmem:[#allocation2 + $0x1f4] sm:$0xf]  ;;  %v833_v36 = vld [vmem:[#allocation2 + $0x1f8] sm:$0xf0]  ;;  %v633_v40 = vld [vmem:[#allocation2 + $0x68] sm:$0xf0]  ;;  %v772_v50 = vor.u32 %v887_v32, %v769_v34 }
  0x1e   :  { %477 = vmatpush.bf16.msra.mxu2 %v728_v6  ;;  %v575_v41 = vld [vmem:[%s1015_s0 + $0x8] sm:$0xf]  ;;  %v840_v42 = vld [vmem:[%s1015_s0 + $0x14] sm:$0xf0]  ;;  %v869_v45 = vld [vmem:[#allocation2 + $0xe4] sm:$0xf]  ;;  %v836_v54 = vor.u32 %v903_v35, %v833_v36  ;;  %v636_v63 = vor.u32 %v853_v39, %v633_v40 }
  0x1f   :  { %491 = vmatpush.bf16.msra.mxu3 %v792_v10  ;;  %v697_v46 = vld [vmem:[#allocation2 + $0xe8] sm:$0xf0]  ;;  %v885_v47 = vld [vmem:[#allocation2 + $0x164] sm:$0xf]  ;;  %v567_v51 = vld [vmem:[%s1015_s0] sm:$0xf]  ;;  %v975_v55 = vor.u32 %v840_v42, %v575_v41 }
  0x20   :  { %450 = vmatpush.bf16.msra.mxu0 %v592_v17  ;;  %v761_v48 = vld [vmem:[#allocation2 + $0x168] sm:$0xf0]  ;;  %v839_v52 = vld [vmem:[%s1015_s0 + $0xc] sm:$0xf0]  ;;  %v577_v56 = vld [vmem:[%s1015_s0 + $0x18] sm:$0xf0]  ;;  %v700_v1 = vor.u32 %v869_v45, %v697_v46 }
  0x21   :  { %464 = vmatpush.bf16.msra.mxu1 %v656_v21  ;;  %v838_v53 = vld [vmem:[%s1015_s0 + $0xc] sm:$0xf]  ;;  %v837_v57 = vld [vmem:[%s1015_s0 + $0x4] sm:$0xf]  ;;  %v569_v58 = vld [vmem:[%s1015_s0 + $0x10] sm:$0xf0]  ;;  %v986_v61 = vor.u32 %v839_v52, %v567_v51  ;;  %v764_v2 = vor.u32 %v885_v47, %v761_v48 }
  0x22   :  { %478 = vmatpush.bf16.msra.mxu2 %v720_v22  ;;  %v901_v59 = vld [vmem:[#allocation2 + $0x1e4] sm:$0xf]  ;;  %v825_v60 = vld [vmem:[#allocation2 + $0x1e8] sm:$0xf0]  ;;  %v988_v62 = vor.u32 %v838_v53, %v577_v56  ;;  %v990_v0 = vor.u32 %v837_v57, %v569_v58  ;;  %v851_v3 = vld [vmem:[#allocation2 + $0x54] sm:$0xf] }
  0x23   :  { %492 = vmatpush.bf16.msra.mxu3 %v784_v26  ;;  %v625_v4 = vld [vmem:[#allocation2 + $0x58] sm:$0xf0]  ;;  %v867_v5 = vld [vmem:[#allocation2 + $0xd4] sm:$0xf]  ;;  %v828_v6 = vor.u32 %v901_v59, %v825_v60  ;;  %v849_v15 = vld [vmem:[#allocation2 + $0x44] sm:$0xf] }
  0x24   :  { %451 = vmatpush.bf16.msra.mxu0 %v584_v33  ;;  %v689_v7 = vld [vmem:[#allocation2 + $0xd8] sm:$0xf0]  ;;  %v883_v8 = vld [vmem:[#allocation2 + $0x154] sm:$0xf]  ;;  %v628_v12 = vor.u32 %v851_v3, %v625_v4  ;;  %v617_v16 = vld [vmem:[#allocation2 + $0x48] sm:$0xf0] }
  0x25   :  { %465 = vmatpush.bf16.msra.mxu1 %v648_v37  ;;  %v753_v9 = vld [vmem:[#allocation2 + $0x158] sm:$0xf0]  ;;  %v899_v10 = vld [vmem:[#allocation2 + $0x1d4] sm:$0xf]  ;;  %v692_v13 = vor.u32 %v867_v5, %v689_v7  ;;  %v865_v17 = vld [vmem:[#allocation2 + $0xc4] sm:$0xf]  ;;  %v620_v24 = vor.u32 %v849_v15, %v617_v16 }
  0x26   :  { %479 = vmatpush.bf16.msra.mxu2 %v712_v38  ;;  %v817_v11 = vld [vmem:[#allocation2 + $0x1d8] sm:$0xf0]  ;;  %v756_v14 = vor.u32 %v883_v8, %v753_v9  ;;  %v681_v19 = vld [vmem:[#allocation2 + $0xc8] sm:$0xf0]  ;;  %v881_v20 = vld [vmem:[#allocation2 + $0x144] sm:$0xf] }
  0x27   :  { %493 = vmatpush.bf16.msra.mxu3 %v776_v43  ;;  %452 = vmatmul.bf16.vlgmr.msra.gmra.mxu0 %v986_v61  ;;  %v820_v18 = vor.u32 %v899_v10, %v817_v11  ;;  %v745_v21 = vld [vmem:[#allocation2 + $0x148] sm:$0xf0]  ;;  %v897_v22 = vld [vmem:[#allocation2 + $0x1c4] sm:$0xf]  ;;  %v684_v25 = vor.u32 %v865_v17, %v681_v19  ;;  %v847_v27 = vld [vmem:[#allocation2 + $0x34] sm:$0xf] }
  0x28   :  { %500 = vmatpush.bf16.msrb.mxu0 %v644_v44  ;;  %466 = vmatmul.bf16.vlgmr.msra.gmra.mxu1 %v990_v0  ;;  %v809_v23 = vld [vmem:[#allocation2 + $0x1c8] sm:$0xf0]  ;;  %v748_v26 = vor.u32 %v881_v20, %v745_v21  ;;  %v609_v28 = vld [vmem:[#allocation2 + $0x38] sm:$0xf0]  ;;  %v863_v29 = vld [vmem:[#allocation2 + $0xb4] sm:$0xf] }
  0x29   :  { %514 = vmatpush.bf16.msrb.mxu1 %v708_v49  ;;  %480 = vmatmul.bf16.vlgmr.msra.gmra.mxu2 %v975_v55  ;;  %v812_v30 = vor.u32 %v897_v22, %v809_v23  ;;  %v673_v31 = vld [vmem:[#allocation2 + $0xb8] sm:$0xf0]  ;;  %v879_v32 = vld [vmem:[#allocation2 + $0x134] sm:$0xf]  ;;  %v612_v36 = vor.u32 %v847_v27, %v609_v28  ;;  %v845_v39 = vld [vmem:[#allocation2 + $0x24] sm:$0xf] }
  0x2a   :  { %528 = vmatpush.bf16.msrb.mxu2 %v772_v50  ;;  %494 = vmatmul.bf16.vlgmr.msra.gmra.mxu3 %v988_v62  ;;  %v737_v33 = vld [vmem:[#allocation2 + $0x138] sm:$0xf0]  ;;  %v895_v34 = vld [vmem:[#allocation2 + $0x1b4] sm:$0xf]  ;;  %v676_v37 = vor.u32 %v863_v29, %v673_v31  ;;  %v601_v40 = vld [vmem:[#allocation2 + $0x28] sm:$0xf0] }
  0x2b   :  { %542 = vmatpush.bf16.msrb.mxu3 %v836_v54  ;;  %v801_v35 = vld [vmem:[#allocation2 + $0x1b8] sm:$0xf0]  ;;  %v740_v38 = vor.u32 %v879_v32, %v737_v33  ;;  %v861_v41 = vld [vmem:[#allocation2 + $0xa4] sm:$0xf]  ;;  %v665_v43 = vld [vmem:[#allocation2 + $0xa8] sm:$0xf0]  ;;  %v604_v48 = vor.u32 %v845_v39, %v601_v40 }
  0x2c   :  { %501 = vmatpush.bf16.msrb.mxu0 %v636_v63  ;;  %v804_v42 = vor.u32 %v895_v34, %v801_v35  ;;  %v877_v44 = vld [vmem:[#allocation2 + $0x124] sm:$0xf]  ;;  %v729_v45 = vld [vmem:[#allocation2 + $0x128] sm:$0xf0]  ;;  %v668_v49 = vor.u32 %v861_v41, %v665_v43  ;;  %v843_v51 = vld [vmem:[#allocation2 + $0x14] sm:$0xf] }
  0x2d   :  { %515 = vmatpush.bf16.msrb.mxu1 %v700_v1  ;;  %v893_v46 = vld [vmem:[#allocation2 + $0x1a4] sm:$0xf]  ;;  %v793_v47 = vld [vmem:[#allocation2 + $0x1a8] sm:$0xf0]  ;;  %v732_v50 = vor.u32 %v877_v44, %v729_v45  ;;  %v593_v52 = vld [vmem:[#allocation2 + $0x18] sm:$0xf0] }
  0x2e   :  { %529 = vmatpush.bf16.msrb.mxu2 %v764_v2  ;;  %v859_v53 = vld [vmem:[#allocation2 + $0x94] sm:$0xf]  ;;  %v796_v54 = vor.u32 %v893_v46, %v793_v47  ;;  %v657_v56 = vld [vmem:[#allocation2 + $0x98] sm:$0xf0]  ;;  %v596_v63 = vor.u32 %v843_v51, %v593_v52  ;;  %v841_v3 = vld [vmem:[#allocation2 + $0x4] sm:$0xf] }
  0x2f   :  { %543 = vmatpush.bf16.msrb.mxu3 %v828_v6  ;;  %v875_v57 = vld [vmem:[#allocation2 + $0x114] sm:$0xf]  ;;  %v721_v58 = vld [vmem:[#allocation2 + $0x118] sm:$0xf0]  ;;  %v660_v1 = vor.u32 %v859_v53, %v657_v56  ;;  %v585_v4 = vld [vmem:[#allocation2 + $0x8] sm:$0xf0] }
  0x30   :  { %502 = vmatpush.bf16.msrb.mxu0 %v628_v12  ;;  %v891_v59 = vld [vmem:[#allocation2 + $0x194] sm:$0xf]  ;;  %v785_v60 = vld [vmem:[#allocation2 + $0x198] sm:$0xf0]  ;;  %v724_v2 = vor.u32 %v875_v57, %v721_v58  ;;  %v857_v5 = vld [vmem:[#allocation2 + $0x84] sm:$0xf]  ;;  %v588_v12 = vor.u32 %v841_v3, %v585_v4 }
  0x31   :  { %516 = vmatpush.bf16.msrb.mxu1 %v692_v13  ;;  %v788_v6 = vor.u32 %v891_v59, %v785_v60  ;;  %v649_v7 = vld [vmem:[#allocation2 + $0x88] sm:$0xf0]  ;;  %v873_v8 = vld [vmem:[#allocation2 + $0x104] sm:$0xf]  ;;  %v98_v16 = vld [vmem:[%s1017_s2] sm:$0x3] }
  0x32   :  { %530 = vmatpush.bf16.msrb.mxu2 %v756_v14  ;;  %v713_v9 = vld [vmem:[#allocation2 + $0x108] sm:$0xf0]  ;;  %v889_v10 = vld [vmem:[#allocation2 + $0x184] sm:$0xf]  ;;  %v652_v13 = vor.u32 %v857_v5, %v649_v7  ;;  %v100_v17 = vperm.slane %v98_v16, 0 }
  0x33   :  { %544 = vmatpush.bf16.msrb.mxu3 %v820_v18  ;;  %v777_v11 = vld [vmem:[#allocation2 + $0x188] sm:$0xf0]  ;;  %v716_v14 = vor.u32 %v873_v8, %v713_v9 }
  0x34   :  { %503 = vmatpush.bf16.msrb.mxu0 %v620_v24  ;;  %v780_v15 = vor.u32 %v889_v10, %v777_v11 }
  0x35   :  { %517 = vmatpush.bf16.msrb.mxu1 %v684_v25 }
  0x36   :  { %531 = vmatpush.bf16.msrb.mxu2 %v748_v26 }
  0x37   :  { %545 = vmatpush.bf16.msrb.mxu3 %v812_v30  ;;  %v101_v30 = vperm.slane %v98_v16, 1 }
  0x38   :  { %504 = vmatpush.bf16.msrb.mxu0 %v612_v36 }
  0x39   :  { %518 = vmatpush.bf16.msrb.mxu1 %v676_v37 }
  0x3a   :  { %532 = vmatpush.bf16.msrb.mxu2 %v740_v38 }
  0x3b   :  { %546 = vmatpush.bf16.msrb.mxu3 %v804_v42 }
  0x3c   :  { %505 = vmatpush.bf16.msrb.mxu0 %v604_v48 }
  0x3d   :  { %519 = vmatpush.bf16.msrb.mxu1 %v668_v49 }
  0x3e   :  { %533 = vmatpush.bf16.msrb.mxu2 %v732_v50 }
  0x3f   :  { %547 = vmatpush.bf16.msrb.mxu3 %v796_v54 }
  0x40   :  { %506 = vmatpush.bf16.msrb.mxu0 %v596_v63 }
  0x41   :  { %520 = vmatpush.bf16.msrb.mxu1 %v660_v1 }
  0x42   :  { %534 = vmatpush.bf16.msrb.mxu2 %v724_v2 }
  0x43   :  { %548 = vmatpush.bf16.msrb.mxu3 %v788_v6 }
  0x44   :  { %507 = vmatpush.bf16.msrb.mxu0 %v588_v12 }
  0x45   :  { %521 = vmatpush.bf16.msrb.mxu1 %v652_v13 }
  0x46   :  { %535 = vmatpush.bf16.msrb.mxu2 %v716_v14 }
  0x47   :  { %549 = vmatpush.bf16.msrb.mxu3 %v780_v15  ;;  %508 = vmatmul.bf16.vlgmr.msrb.gmra.mxu0 %v986_v61 }
  0x48   :  { %522 = vmatmul.bf16.vlgmr.msrb.gmra.mxu1 %v990_v0 }
  0x49   :  { %536 = vmatmul.bf16.vlgmr.msrb.gmra.mxu2 %v975_v55 }
  0x4a   :  { %550 = vmatmul.bf16.vlgmr.msrb.gmra.mxu3 %v988_v62 }
  0xa4   :  { %v453_v18 = vpop.f32.mrf.mxu0 }
  0xa5   :  { %v454_v19 = vadd.f32 %v453_v18, %v100_v17  ;;  %v467_v20 = vpop.f32.mrf.mxu1 }
  0xa7   :  { %v468_v21 = vadd.f32 %v467_v20, %v454_v19 }
  0xac   :  { %v481_v22 = vpop.f32.mrf.mxu2  ;;  %v455_v61 = vpop.f32.mrf.mxu0 }
  0xad   :  { %v482_v23 = vadd.f32 %v481_v22, %v468_v21  ;;  %v495_v24 = vpop.f32.mrf.mxu3  ;;  %v456_v26 = vadd.f32 %v455_v61, %v100_v17  ;;  %v469_v0 = vpop.f32.mrf.mxu1 }
  0xaf   :  { %v496_v25 = vadd.f32 %v495_v24, %v482_v23  ;;  %v470_v55 = vadd.f32 %v469_v0, %v456_v26 }
  0xb1   :  { %556 = vst [vmem:[%s1018_s3] sm:$0xff] %v496_v25 }
  0xb4   :  { %v483_v62 = vpop.f32.mrf.mxu2 }
  0xb5   :  { %v484_v27 = vadd.f32 %v483_v62, %v470_v55  ;;  %v497_v28 = vpop.f32.mrf.mxu3 }
  0xb7   :  { %v498_v29 = vadd.f32 %v497_v28, %v484_v27 }
  0xb9   :  { %558 = vst [vmem:[%s1018_s3 + $0x10] sm:$0xff] %v498_v29 }
  0xc4   :  { %v509_v31 = vpop.f32.mrf.mxu0 }
  0xc5   :  { %v510_v32 = vadd.f32 %v509_v31, %v101_v30  ;;  %v523_v33 = vpop.f32.mrf.mxu1 }
  0xc7   :  { %v524_v34 = vadd.f32 %v523_v33, %v510_v32 }
  0xcc   :  { %v537_v35 = vpop.f32.mrf.mxu2  ;;  %v511_v38 = vpop.f32.mrf.mxu0 }
  0xcd   :  { %v538_v36 = vadd.f32 %v537_v35, %v524_v34  ;;  %v551_v37 = vpop.f32.mrf.mxu3  ;;  %v512_v40 = vadd.f32 %v511_v38, %v101_v30  ;;  %v525_v41 = vpop.f32.mrf.mxu1 }
  0xcf   :  { %v552_v39 = vadd.f32 %v551_v37, %v538_v36  ;;  %v526_v42 = vadd.f32 %v525_v41, %v512_v40 }
  0xd1   :  { %557 = vst [vmem:[%s1018_s3 + $0x8] sm:$0xff] %v552_v39 }
  0xd4   :  { %v539_v43 = vpop.f32.mrf.mxu2 }
  0xd5   :  { %v540_v44 = vadd.f32 %v539_v43, %v526_v42  ;;  %v553_v45 = vpop.f32.mrf.mxu3 }
  0xd7   :  { %v554_v46 = vadd.f32 %v553_v45, %v540_v44 }
  0xd9   :  { %559 = vst [vmem:[%s1018_s3 + $0x18] sm:$0xff] %v554_v46 }
  0xda   :  { %564 = vsyncpa [#allocation3], 1 }

</bundles_post_ra>
